<compile_context>
chip_gen: v7x
topology: tpu7x:2x2x1
jax: 0.10.0
libtpu: 0.0.40
codegen_flags: <defaults>
</compile_context>

<pallas_src>
import functools

import jax
import jax.numpy as jnp
from jax.experimental import pallas as pl
from jax.experimental.pallas import tpu as pltpu


# ----------------------------------------------------------------------------
# Helpers
# ----------------------------------------------------------------------------
def _round_up(x, m):
    return ((x + m - 1) // m) * m


def _ln_axis0(x, eps=1e-5):
    # LayerNorm over the feature axis (axis 0 in the batch-on-lanes layout).
    # One pass: var = E[x^2] - mean^2 (fine for post-ReLU f32 activations);
    # the affine (gamma/beta) has been folded into the next layer's weights.
    mean = jnp.mean(x, axis=0, keepdims=True)
    mean_sq = jnp.mean(x * x, axis=0, keepdims=True)
    var = jnp.maximum(mean_sq - mean * mean, 0.0)
    return (x - mean) * jax.lax.rsqrt(var + eps)


# ----------------------------------------------------------------------------
# Kernel (batch-on-lanes layout; weights resident full blocks)
# ----------------------------------------------------------------------------
def _reward_kernel(x_ref, w1_ref, b1_ref, w2_ref, b2_ref, w3_ref, b3_ref,
                   out_ref, *, ln):
    # x_ref : [in_pad, bt]   features on sublanes, batch on lanes
    # w1_ref: [fc1, in_pad]  b1_ref: [fc1, 1]
    # w2_ref: [fc2, fc1]     b2_ref: [fc2, 1]
    # w3_ref: [fc2, 1]       b3_ref: [1, 1]
    # out_ref: [1, bt]       lane-dense unmasked store
    h1 = jnp.dot(w1_ref[...], x_ref[...], preferred_element_type=jnp.float32)
    h1 = jnp.maximum(h1 + b1_ref[...], 0.0)                     # relu(fc1)
    if ln:
        h1 = _ln_axis0(h1)

    h2 = jnp.dot(w2_ref[...], h1, preferred_element_type=jnp.float32)
    h2 = jnp.maximum(h2 + b2_ref[...], 0.0)                     # relu(fc2)
    if ln:
        h2 = _ln_axis0(h2)

    # fc3 (fc2 -> 1): VPU mul + sublane (XLU) reduce; result is a lane-dense
    # [1, bt] row (MXU/XLU are otherwise idle, VALU is the loaded slot).
    q = jnp.sum(h2 * w3_ref[...], axis=0, keepdims=True)
    out_ref[...] = q + b3_ref[...]


# ----------------------------------------------------------------------------
# Wrapper
# ----------------------------------------------------------------------------
def reward_network_forward(state, state_, action, params, *, ln=False,
                           block_b=4096, min_grid_steps=1):
    """Pallas forward pass of RewardNetwork.

    state, state_: [B, input_dims]; action: [B, n_actions]; returns [B, 1].
    params: dict with w1,b1,w2,b2,w3,b3 (+ g1,be1,g2,be2 if ln).
    Weights wK are stored [in, out] (transposed vs. PyTorch's [out, in]).

    min_grid_steps: set to 2 on v7x so the 'parallel' batch axis shards over
    both TensorCores; leave at 1 on single-TC chips (v5e/v6e) so the serial
    grid has the fewest possible steps.
    """
    B = state.shape[0]
    in_feat = state.shape[1] + state_.shape[1] + action.shape[1]
    in_pad = _round_up(in_feat, 8)

    # Batch-on-lanes layout, built OUTSIDE the kernel: x = [in_pad, b_pad].
    # Batch tiles are lane tiles (multiples of 128) -> lane-dense DMA, VPU
    # work and output stores.  Padded feature rows of x are zeros and the
    # matching rows of w1 are zero, so the padding is a numerical no-op.
    x = jnp.concatenate([state.T, state_.T, action.T],
                        axis=0).astype(jnp.float32)

    bt = min(_round_up(block_b, 128), _round_up(max(B, 1), 128))
    if min_grid_steps > 1:
        bt = min(bt, max(128, _round_up(-(-B // min_grid_steps), 128)))
    b_pad = _round_up(B, bt)

    pad_rows = in_pad - in_feat
    pad_cols = b_pad - B
    if pad_rows or pad_cols:
        x = jnp.pad(x, ((0, pad_rows), (0, pad_cols)))

    # ---- Weight prep (all float32; v5e has no bf16 VPU/EUP) ----------------
    w1 = params["w1"].astype(jnp.float32)                       # [in_feat, fc1]
    if w1.shape[0] != in_pad:
        w1 = jnp.pad(w1, ((0, in_pad - w1.shape[0]), (0, 0)))   # zero rows
    w2 = params["w2"].astype(jnp.float32)                       # [fc1, fc2]
    w3 = params["w3"].astype(jnp.float32)                       # [fc2, 1]
    b1 = params["b1"].astype(jnp.float32).reshape(1, -1)
    b2 = params["b2"].astype(jnp.float32).reshape(1, -1)
    b3 = params["b3"].astype(jnp.float32).reshape(1, 1)

    if ln:
        # Fold the LayerNorm affine into the following layer:
        #   (LN(x)*g + be) @ W + b  ==  LN(x) @ (g[:,None]*W) + (be @ W + b)
        g1 = params["g1"].astype(jnp.float32).reshape(1, -1)
        be1 = params["be1"].astype(jnp.float32).reshape(1, -1)
        g2 = params["g2"].astype(jnp.float32).reshape(1, -1)
        be2 = params["be2"].astype(jnp.float32).reshape(1, -1)
        b2 = be1 @ w2 + b2
        w2 = g1.T * w2
        b3 = be2 @ w3 + b3
        w3 = g2.T * w3

    # Transposed (batch-on-lanes) operands; constant block index -> DMA'd
    # once, resident in VMEM across the whole batch grid.
    weights = (w1.T, b1.T, w2.T, b2.T, w3, b3)

    grid = (b_pad // bt,)
    x_spec = pl.BlockSpec((in_pad, bt), lambda i: (0, i))
    w_specs = [pl.BlockSpec(w.shape, lambda i: (0, 0)) for w in weights]
    out_spec = pl.BlockSpec((1, bt), lambda i: (0, i))

    out = pl.pallas_call(
        functools.partial(_reward_kernel, ln=ln),
        out_shape=jax.ShapeDtypeStruct((1, b_pad), jnp.float32),
        grid=grid,
        in_specs=[x_spec] + w_specs,
        out_specs=out_spec,
        compiler_params=pltpu.CompilerParams(
            dimension_semantics=("parallel",)),
    )(x, *weights)
    return out[0, :B][:, None]


# ----------------------------------------------------------------------------
# Deterministic parameter init (mimics PyTorch nn.Linear default: U(-k, k),
# k = 1/sqrt(fan_in)), stored pre-transposed as [in, out].
# ----------------------------------------------------------------------------
def init_reward_network_params(key, input_dims, fc1_dims, fc2_dims, n_actions,
                               ln=False):
    in_feat = 2 * input_dims + n_actions
    dims = [(in_feat, fc1_dims), (fc1_dims, fc2_dims), (fc2_dims, 1)]
    params = {}
    keys = jax.random.split(key, 6)
    for i, (fan_in, fan_out) in enumerate(dims, start=1):
        bound = 1.0 / jnp.sqrt(jnp.float32(fan_in))
        params[f"w{i}"] = jax.random.uniform(
            keys[2 * (i - 1)], (fan_in, fan_out), jnp.float32, -bound, bound)
        params[f"b{i}"] = jax.random.uniform(
            keys[2 * (i - 1) + 1], (1, fan_out), jnp.float32, -bound, bound)
    if ln:
        params["g1"] = jnp.ones((1, fc1_dims), jnp.float32)
        params["be1"] = jnp.zeros((1, fc1_dims), jnp.float32)
        params["g2"] = jnp.ones((1, fc2_dims), jnp.float32)
        params["be2"] = jnp.zeros((1, fc2_dims), jnp.float32)
    return params


# Pure-JAX reference for correctness checking (two-pass LN, like PyTorch).
def _reference_forward(state, state_, action, params, ln=False):
    sa = jnp.concatenate([state, state_, action], axis=1)

    def _ln(x, g, b, eps=1e-5):
        mean = jnp.mean(x, axis=-1, keepdims=True)
        var = jnp.mean(jnp.square(x - mean), axis=-1, keepdims=True)
        return (x - mean) / jnp.sqrt(var + eps) * g + b

    h1 = jnp.maximum(sa @ params["w1"] + params["b1"], 0.0)
    if ln:
        h1 = _ln(h1, params["g1"], params["be1"])
    h2 = jnp.maximum(h1 @ params["w2"] + params["b2"], 0.0)
    if ln:
        h2 = _ln(h2, params["g2"], params["be2"])
    return h2 @ params["w3"] + params["b3"]


if __name__ == "__main__":
    # Pendulum-like sizes: obs dim 3, action dim 1, small hidden layers.
    batch = 8
    input_dims = 3
    n_actions = 1
    fc1_dims = 32
    fc2_dims = 32

    key = jax.random.PRNGKey(0)
    k_s, k_s2, k_a, k_p = jax.random.split(key, 4)

    state = jax.random.normal(k_s, (batch, input_dims), jnp.float32)
    state_ = jax.random.normal(k_s2, (batch, input_dims), jnp.float32)
    action = jax.random.normal(k_a, (batch, n_actions), jnp.float32)

    # Both variants (no-LN and LN), single-block path (B padded to one lane
    # tile of 128).
    for ln in (False, True):
        params = init_reward_network_params(
            k_p, input_dims, fc1_dims, fc2_dims, n_actions, ln=ln)
        out = reward_network_forward(state, state_, action, params, ln=ln)
        out = jax.block_until_ready(out)
        ref = _reference_forward(state, state_, action, params, ln=ln)
        assert out.shape == (batch, 1)
        assert jnp.allclose(out, ref, atol=1e-4, rtol=1e-4), (
            ln, float(jnp.max(jnp.abs(out - ref))))

    # Multi-block grid path with a ragged batch (pads to lane tiles, slices
    # back); block_b=128 forces grid=(3,).  Also exercise min_grid_steps=2
    # (v7x-style two-TC split).
    big_b = 300
    kb = jax.random.split(key, 3)
    st = jax.random.normal(kb[0], (big_b, input_dims), jnp.float32)
    st2 = jax.random.normal(kb[1], (big_b, input_dims), jnp.float32)
    ac = jax.random.normal(kb[2], (big_b, n_actions), jnp.float32)
    params = init_reward_network_params(
        k_p, input_dims, fc1_dims, fc2_dims, n_actions, ln=True)
    ref = _reference_forward(st, st2, ac, params, ln=True)

    out = jax.block_until_ready(
        reward_network_forward(st, st2, ac, params, ln=True, block_b=128))
    assert out.shape == (big_b, 1)
    assert jnp.allclose(out, ref, atol=1e-4, rtol=1e-4), float(
        jnp.max(jnp.abs(out - ref)))

    out2 = jax.block_until_ready(
        reward_network_forward(st, st2, ac, params, ln=True,
                               min_grid_steps=2))
    assert out2.shape == (big_b, 1)
    assert jnp.allclose(out2, ref, atol=1e-4, rtol=1e-4), float(
        jnp.max(jnp.abs(out2 - ref)))

    print("KERNEL_OK")
</pallas_src>

<mosaic_0001>
module attributes {stable_mosaic.version = 11 : i64} {
  func.func @_reward_kernel(%arg0: i32, %arg1: memref<8x128xf32, #tpu.memory_space<vmem>>, %arg2: memref<32x8xf32, #tpu.memory_space<vmem>>, %arg3: memref<32x1xf32, #tpu.memory_space<vmem>>, %arg4: memref<32x32xf32, #tpu.memory_space<vmem>>, %arg5: memref<32x1xf32, #tpu.memory_space<vmem>>, %arg6: memref<32x1xf32, #tpu.memory_space<vmem>>, %arg7: memref<1x1xf32, #tpu.memory_space<vmem>>, %arg8: memref<1x128xf32, #tpu.memory_space<vmem>>) attributes {dimension_semantics = [#tpu.dimension_semantics<parallel>], iteration_bounds = array<i64: 1>, scalar_prefetch = 0 : i64, scratch_operands = 0 : i64, tpu.core_type = #tpu.core_type<tc>, window_params = [{transform_indices = @transform_0, window_bounds = array<i64: 8, 128>}, {pipeline_mode = #tpu.pipeline_mode<synchronous>, transform_indices = @transform_1, window_bounds = array<i64: 32, 8>}, {pipeline_mode = #tpu.pipeline_mode<synchronous>, transform_indices = @transform_2, window_bounds = array<i64: 32, 1>}, {pipeline_mode = #tpu.pipeline_mode<synchronous>, transform_indices = @transform_3, window_bounds = array<i64: 32, 32>}, {pipeline_mode = #tpu.pipeline_mode<synchronous>, transform_indices = @transform_4, window_bounds = array<i64: 32, 1>}, {pipeline_mode = #tpu.pipeline_mode<synchronous>, transform_indices = @transform_5, window_bounds = array<i64: 32, 1>}, {pipeline_mode = #tpu.pipeline_mode<synchronous>, transform_indices = @transform_6, window_bounds = array<i64: 1, 1>}, {transform_indices = @transform_7, window_bounds = array<i64: 1, 128>}]} {
    %c0 = arith.constant 0 : index
    %c0_0 = arith.constant 0 : index
    %0 = vector.load %arg2[%c0, %c0_0] : memref<32x8xf32, #tpu.memory_space<vmem>>, vector<32x8xf32>
    %c0_1 = arith.constant 0 : index
    %c0_2 = arith.constant 0 : index
    %1 = vector.load %arg1[%c0_1, %c0_2] : memref<8x128xf32, #tpu.memory_space<vmem>>, vector<8x128xf32>
    %cst = arith.constant dense<0.000000e+00> : vector<32x128xf32>
    %2 = tpu.matmul %0, %1, %cst {dimension_numbers = #tpu.dot_dimension_numbers<[1], [0], [0], [1], [0, 0, 1, 1], [], []>} : vector<32x8xf32>, vector<8x128xf32>, vector<32x128xf32> -> vector<32x128xf32>
    %c0_3 = arith.constant 0 : index
    %c0_4 = arith.constant 0 : index
    %3 = vector.load %arg3[%c0_3, %c0_4] : memref<32x1xf32, #tpu.memory_space<vmem>>, vector<32x1xf32>
    %4 = vector.broadcast %3 : vector<32x1xf32> to vector<32x128xf32>
    %5 = arith.addf %2, %4 : vector<32x128xf32>
    %cst_5 = arith.constant 0.000000e+00 : f32
    %6 = vector.broadcast %cst_5 : f32 to vector<32x128xf32>
    %7 = arith.maximumf %5, %6 : vector<32x128xf32>
    %c0_6 = arith.constant 0 : index
    %c0_7 = arith.constant 0 : index
    %8 = vector.load %arg4[%c0_6, %c0_7] : memref<32x32xf32, #tpu.memory_space<vmem>>, vector<32x32xf32>
    %cst_8 = arith.constant dense<0.000000e+00> : vector<32x128xf32>
    %9 = tpu.matmul %8, %7, %cst_8 {dimension_numbers = #tpu.dot_dimension_numbers<[1], [0], [0], [1], [0, 0, 1, 1], [], []>} : vector<32x32xf32>, vector<32x128xf32>, vector<32x128xf32> -> vector<32x128xf32>
    %c0_9 = arith.constant 0 : index
    %c0_10 = arith.constant 0 : index
    %10 = vector.load %arg5[%c0_9, %c0_10] : memref<32x1xf32, #tpu.memory_space<vmem>>, vector<32x1xf32>
    %11 = vector.broadcast %10 : vector<32x1xf32> to vector<32x128xf32>
    %12 = arith.addf %9, %11 : vector<32x128xf32>
    %cst_11 = arith.constant 0.000000e+00 : f32
    %13 = vector.broadcast %cst_11 : f32 to vector<32x128xf32>
    %14 = arith.maximumf %12, %13 : vector<32x128xf32>
    %c0_12 = arith.constant 0 : index
    %c0_13 = arith.constant 0 : index
    %15 = vector.load %arg6[%c0_12, %c0_13] : memref<32x1xf32, #tpu.memory_space<vmem>>, vector<32x1xf32>
    %16 = vector.broadcast %15 : vector<32x1xf32> to vector<32x128xf32>
    %17 = arith.mulf %14, %16 : vector<32x128xf32>
    %cst_14 = arith.constant dense<0.000000e+00> : vector<128xf32>
    %18 = vector.multi_reduction <add>, %17, %cst_14 [0] : vector<32x128xf32> to vector<128xf32>
    %19 = vector.shape_cast %18 : vector<128xf32> to vector<1x128xf32>
    %c0_15 = arith.constant 0 : index
    %c0_16 = arith.constant 0 : index
    %20 = vector.load %arg7[%c0_15, %c0_16] : memref<1x1xf32, #tpu.memory_space<vmem>>, vector<1x1xf32>
    %21 = vector.broadcast %20 : vector<1x1xf32> to vector<1x128xf32>
    %22 = arith.addf %19, %21 : vector<1x128xf32>
    %c0_17 = arith.constant 0 : index
    %c0_18 = arith.constant 0 : index
    %23 = vector.load %arg8[%c0_17, %c0_18] : memref<1x128xf32, #tpu.memory_space<vmem>>, vector<1x128xf32>
    tpu.vector_store %arg8[%c0_17, %c0_18], %22 {strides = array<i32>} : memref<1x128xf32, #tpu.memory_space<vmem>>, vector<1x128xf32>,
    return
  }
  func.func @transform_0(%arg0: i32) -> (i32, i32) {
    %c0_i32 = arith.constant 0 : i32
    %c0_i32_0 = arith.constant 0 : i32
    return %c0_i32, %arg0 : i32, i32
  }
  func.func @transform_1(%arg0: i32) -> (i32, i32) {
    %c0_i32 = arith.constant 0 : i32
    %c0_i32_0 = arith.constant 0 : i32
    %c0_i32_1 = arith.constant 0 : i32
    return %c0_i32, %c0_i32_0 : i32, i32
  }
  func.func @transform_2(%arg0: i32) -> (i32, i32) {
    %c0_i32 = arith.constant 0 : i32
    %c0_i32_0 = arith.constant 0 : i32
    %c0_i32_1 = arith.constant 0 : i32
    return %c0_i32, %c0_i32_0 : i32, i32
  }
  func.func @transform_3(%arg0: i32) -> (i32, i32) {
    %c0_i32 = arith.constant 0 : i32
    %c0_i32_0 = arith.constant 0 : i32
    %c0_i32_1 = arith.constant 0 : i32
    return %c0_i32, %c0_i32_0 : i32, i32
  }
  func.func @transform_4(%arg0: i32) -> (i32, i32) {
    %c0_i32 = arith.constant 0 : i32
    %c0_i32_0 = arith.constant 0 : i32
    %c0_i32_1 = arith.constant 0 : i32
    return %c0_i32, %c0_i32_0 : i32, i32
  }
  func.func @transform_5(%arg0: i32) -> (i32, i32) {
    %c0_i32 = arith.constant 0 : i32
    %c0_i32_0 = arith.constant 0 : i32
    %c0_i32_1 = arith.constant 0 : i32
    return %c0_i32, %c0_i32_0 : i32, i32
  }
  func.func @transform_6(%arg0: i32) -> (i32, i32) {
    %c0_i32 = arith.constant 0 : i32
    %c0_i32_0 = arith.constant 0 : i32
    %c0_i32_1 = arith.constant 0 : i32
    return %c0_i32, %c0_i32_0 : i32, i32
  }
  func.func @transform_7(%arg0: i32) -> (i32, i32) {
    %c0_i32 = arith.constant 0 : i32
    %c0_i32_0 = arith.constant 0 : i32
    return %c0_i32, %arg0 : i32, i32
  }
}

</mosaic_0001>

<bundles_post_ra>
// kernel: tpu_custom_call.1
= control target key start
LH: loop header
LB: loop body
LE: loop exit
PB: predicated region body
PF: predicated region fallthrough
CT: control target
= control target key end

     0   :  { %s564_s0 = inlined_call_operand.vmem [shape: f32[8,128], index: 0, kind: input, shape index: {}]   ;;  %s565_s1 = inlined_call_operand.vmem [shape: f32[32,8], index: 1, kind: input, shape index: {}]   ;;  %s566_s2 = inlined_call_operand.vmem [shape: f32[32,1], index: 2, kind: input, shape index: {}]   ;;  %s567_s3 = inlined_call_operand.vmem [shape: f32[32,32], index: 3, kind: input, shape index: {}]   ;;  %s568_s4 = inlined_call_operand.vmem [shape: f32[32,1], index: 4, kind: input, shape index: {}]   ;;  %s569_s5 = inlined_call_operand.vmem [shape: f32[32,1], index: 5, kind: input, shape index: {}]   ;;  %s570_s6 = inlined_call_operand.<no memory space> [shape: f32[1,1], index: 6, kind: input, shape index: {}]   ;;  %s571_s7 = inlined_call_operand.hbm [shape: f32[1,128], index: 7, kind: output, shape index: {}]  }
   0x1   :  { %v12_v0 = vstv %s570_s6 }
   0x2   :  { %13 = vst [vmem:[#allocation2] sm:$0x1] %v12_v0 }
   0x3   :  { %v33_v1 = vld [vmem:[%s564_s0] sm:$0xff]  ;;  %vm58_vm0 = vcmask 64512   ;;  %v30_v3 = vld [vmem:[%s565_s1 + $0x8] sm:$0xff]  ;;  %v31_v4 = vld [vmem:[%s565_s1 + $0x10] sm:$0xff]  ;;  %v436_v6 = vmov 0  }
   0x4   :  { %v29_v2 = vld [vmem:[%s565_s1] sm:$0xff]  ;;  %374 = vmatprep.subr.mxu0 %v33_v1  ;;  %410 = vset.pattern.permute.xlu0 %v436_v6  ;;  %v36_v7 = vld [vmem:[%s566_s2 + $0x10] sm:$0xff]  ;;  %v32_v8 = vld [vmem:[%s565_s1 + $0x18] sm:$0xff] }
   0x5   :  { %376 = vmatprep.mubr.msk.f32.mxu0 %vm58_vm0, %v29_v2  ;;  %v34_v5 = vld [vmem:[%s566_s2] sm:$0xff]  ;;  %375 = vmatpush3.msra.mxu0 %v33_v1  ;;  %v35_v9 = vld [vmem:[%s566_s2 + $0x8] sm:$0xff]  ;;  %v37_v10 = vld [vmem:[%s566_s2 + $0x18] sm:$0xff] }
   0x6   :  { %377 = vmatmul.mubr.msk.f32.vlgmr.msra.gmra.mrb[0].mxu0 %vm58_vm0, %v30_v3  ;;  %40 = vperm.xlu0 %410, %v34_v5  }
   0x7   :  { %379 = vmatprep.mubr.msk.f32.mxu0 %vm58_vm0, %v31_v4  ;;  %411 = vset.pattern.permute.xlu1 %v436_v6 }
   0x8   :  { %50 = vperm.xlu1 %411, %v36_v7  }
   0x9   :  { %14 = vsyncpa [#allocation4], 0  ;;  %v164_v11 = vld [vmem:[%s568_s4] sm:$0xff]  ;;  %v165_v12 = vld [vmem:[%s568_s4 + $0x8] sm:$0xff]  ;;  %vm188_vm1 = vcmask 261120   ;;  %v333_v4 = vlaneseq }
   0xa   :  { %380 = vmatmul.mubr.msk.f32.gmra.mrb[2].mxu0 %vm58_vm0, %v32_v8  ;;  %45 = vperm.xlu0 %410, %v35_v9   ;;  %v166_v13 = vld [vmem:[%s568_s4 + $0x10] sm:$0xff]  ;;  %v167_v14 = vld [vmem:[%s568_s4 + $0x18] sm:$0xff]  ;;  %v290_v15 = vld [vmem:[%s569_s5] sm:$0xff] }
   0xb   :  { %v291_v16 = vld [vmem:[%s569_s5 + $0x8] sm:$0xff]  ;;  %v292_v17 = vld [vmem:[%s569_s5 + $0x10] sm:$0xff]  ;;  %v293_v18 = vld [vmem:[%s569_s5 + $0x18] sm:$0xff]  ;;  %v334_v7 = vshrl.u32 %v333_v4, 7 }
   0xc   :  { %55 = vperm.xlu1 %411, %v37_v10   ;;  %v327_v19 = vld [vmem:[#allocation2] sm:$0x1]  ;;  %v162_v21 = vld [vmem:[%s567_s3 + $0x10] sm:$0xff]  ;;  %v161_v40 = vld [vmem:[%s567_s3 + $0x8] sm:$0xff] }
   0xd   :  { %v160_v20 = vld [vmem:[%s567_s3] sm:$0xff]  ;;  %393 = vmatprep.mubr.msk.f32.mxu1 %vm188_vm1, %v162_v21  ;;  %v163_v41 = vld [vmem:[%s567_s3 + $0x18] sm:$0xff]  ;;  %v335_v10 = vsub.s32 0, %v334_v7  ;;  %s437_s3 = smov [#allocation3]  }
   0xe   :  { %170 = vperm.xlu0 %410, %v164_v11   ;;  %390 = vmatprep.mubr.msk.f32.mxu0 %vm188_vm1, %v160_v20  ;;  %s345_s14 = sshll.u32 %s437_s3, 4  ;;  %s346_s14 = int_to_ptr.vmem [resolvable:$true] %s345_s14 }
   0xf   :  { %s412_s15 = scalar_lea.vmem %s346_s14, 16  ;;  %s416_s16 = scalar_lea.vmem %s346_s14, 32 }
  0x10   :  { %175 = vperm.xlu1 %411, %v165_v12   ;;  %p413_p0 = scmp.ne.s32.totalorder %s346_s14, %s412_s15  ;;  %p417_p1 = scmp.lt.s32.totalorder %s346_s14, %s346_s14 }
  0x11   :  { %p418_p2 = scmp.lt.s32.totalorder %s416_s16, %s412_s15 }
  0x12   :  { %180 = vperm.xlu0 %410, %v166_v13  }
  0x13   :  { %p419_p3 = por %p418_p2, %p417_p1 }
  0x14   :  { %185 = vperm.xlu1 %411, %v167_v14  }
  0x15   :  { %p420_p4 = pnand %p419_p3, %p413_p0 }
  0x16   :  { %296 = vperm.xlu0 %410, %v290_v15  }
  0x18   :  { %301 = vperm.xlu1 %411, %v291_v16  }
  0x1a   :  { %306 = vperm.xlu0 %410, %v292_v17  }
  0x1c   :  { %311 = vperm.xlu1 %411, %v293_v18  }
  0x1e   :  { %330 = vperm.xlu0 %410, %v327_v19  }
  0x85   :  { %v41_v22 = vpop.permute.xlu0 %40 }
  0x87   :  { %v51_v23 = vpop.permute.xlu1 %50 }
  0x89   :  { %v46_v24 = vpop.permute.xlu0 %45 }
  0x8b   :  { %v56_v30 = vpop.permute.xlu1 %55 }
  0x8d   :  { %v171_v42 = vpop.permute.xlu0 %170 }
  0x8f   :  { %v176_v43 = vpop.permute.xlu1 %175 }
  0x91   :  { %v181_v44 = vpop.permute.xlu0 %180 }
  0x93   :  { %v186_v45 = vpop.permute.xlu1 %185 }
  0x95   :  { %v297_v46 = vpop.permute.xlu0 %296 }
  0x97   :  { %v302_v55 = vpop.permute.xlu1 %301 }
  0x99   :  { %v307_v62 = vpop.permute.xlu0 %306 }
  0x9b   :  { %v312_v1 = vpop.permute.xlu1 %311 }
  0x9d   :  { %v331_v12 = vpop.permute.xlu0 %330 }
  0x9e   :  { %v336_v14 = vrot.slane %v331_v12, %v335_v10 }
  0xd9   :  { %v378_v25 = vpop.f32.mrb[0].mxu0 }
  0xda   :  { %v143_v26 = vadd.f32 %v378_v25, %v46_v24  ;;  %v137_v27 = vpop.f32.mrb[1].mxu0 }
  0xdb   :  { %v138_v28 = vadd.f32 %v137_v27, %v41_v22 }
  0xdc   :  { %v157_v29 = vmax.f32 %v143_v26, 0.0 }
  0xdd   :  { %v156_v31 = vmax.f32 %v138_v28, 0.0  ;;  %v381_v32 = vpop.f32.mrb[2].mxu0 }
  0xde   :  { %v153_v33 = vadd.f32 %v381_v32, %v56_v30  ;;  %v147_v34 = vpop.f32.mrb[3].mxu0 }
  0xdf   :  { %v396_v35 = vpack.c.bf16 %v157_v29, %v156_v31  ;;  %v148_v36 = vadd.f32 %v147_v34, %v51_v23 }
  0xe0   :  { %v159_v37 = vmax.f32 %v153_v33, 0.0 }
  0xe1   :  { %v158_v38 = vmax.f32 %v148_v36, 0.0  ;;  %397 = vmatprep.subr.bf16.mxu0 %v396_v35  ;;  %404 = vmatprep.subr.bf16.mxu1 %v396_v35 }
  0xe2   :  { %399 = vmatpush3.bf16.msra.mxu0 %v396_v35  ;;  %406 = vmatpush3.bf16.msra.mxu1 %v396_v35 }
  0xe3   :  { %v400_v39 = vpack.c.bf16 %v159_v37, %v158_v38 }
  0xe5   :  { %401 = vmatprep.subr.bf16.mxu0 %v400_v39  ;;  %405 = vmatprep.subr.bf16.mxu1 %v400_v39 }
  0xe6   :  { %403 = vmatpush3.bf16.msra.mxu0 %v400_v39  ;;  %407 = vmatpush3.bf16.msra.mxu1 %v400_v39 }
  0xe9   :  { %391 = vmatmul.mubr.msk.f32.vlgmr.msra.gmra.mrb[4].mxu0 %vm188_vm1, %v161_v40  ;;  %394 = vmatmul.mubr.msk.f32.vlgmr.msra.gmra.mrb[0].mxu1 %vm188_vm1, %v163_v41 }
 0x1bc   :  { %v392_v47 = vpop.f32.mrb[4].mxu0  ;;  %v395_v48 = vpop.f32.mrb[0].mxu1 }
 0x1bd   :  { %v273_v49 = vadd.f32 %v392_v47, %v176_v43  ;;  %v267_v50 = vpop.f32.mrb[5].mxu0  ;;  %v277_v51 = vpop.f32.mrb[1].mxu1  ;;  %v283_v52 = vadd.f32 %v395_v48, %v186_v45 }
 0x1be   :  { %v268_v53 = vadd.f32 %v267_v50, %v171_v42  ;;  %v278_v54 = vadd.f32 %v277_v51, %v181_v44 }
 0x1bf   :  { %v287_v56 = vmax.f32 %v273_v49, 0.0  ;;  %v289_v60 = vmax.f32 %v283_v52, 0.0 }
 0x1c0   :  { %v286_v57 = vmax.f32 %v268_v53, 0.0  ;;  %v288_v58 = vmax.f32 %v278_v54, 0.0 }
 0x1c1   :  { %v315_v59 = vmul.f32 %v302_v55, %v287_v56  ;;  %v317_v2 = vmul.f32 %v312_v1, %v289_v60 }
 0x1c2   :  { %v314_v61 = vmul.f32 %v297_v46, %v286_v57  ;;  %v316_v0 = vmul.f32 %v307_v62, %v288_v58 }
 0x1c4   :  { %v318_v63 = vadd.f32 %v315_v59, %v314_v61 }
 0x1c6   :  { %v319_v3 = vadd.f32 %v318_v63, %v316_v0 }
 0x1c8   :  { %v320_v5 = vadd.f32 %v319_v3, %v317_v2 }
 0x1ca   :  { %v321_v6 = vrot.slane %v320_v5, 4 }
 0x1cc   :  { %v322_v8 = vadd.f32 %v321_v6, %v320_v5 }
 0x1ce   :  { %v323_v9 = vrot.slane %v322_v8, 2 }
 0x1d0   :  { %v324_v11 = vadd.f32 %v323_v9, %v322_v8 }
 0x1d2   :  { %v325_v13 = vrot.slane %v324_v11, 1 }
 0x1d4   :  { %v326_v15 = vadd.f32 %v325_v13, %v324_v11 }
 0x1d6   :  { %v337_v16 = vadd.f32 %v336_v14, %v326_v15 }
 0x1d8   :  { %338 = vst [vmem:[#allocation3] sm:$0x1] %v337_v16 }
 0x1d9   :  { %423 = shalt.err (!%p420_p4)
}
 0x1da   :  { %s424_s19 = scalar_lea.hbm %s571_s7, 16 }
 0x1db   :  { %p425_p5 = scmp.ne.s32.totalorder %s571_s7, %s424_s19  ;;  %p428_p6 = scmp.lt.u32.totalorder %s424_s19, %s571_s7 }
 0x1dd   :  { %p430_p7 = pnand %p428_p6, %p425_p5 }
 0x1df   :  { %433 = shalt.err (!%p430_p7)
}
 0x1e0   :  { %348 = dma.vmem_to_hbm [thread:$0]  %s346_s14, 16, %s571_s7, [#allocation4]  }
 0x1e1   :  { %434 = dma.done.wait [#allocation4], 16  }
 0x1e2   :  { %435 = vsyncadd [#allocation4], 4294967280 }
 0x1e3   :  { %352 = vsyncpa [#allocation4], 1 }

</bundles_post_ra>
